<compile_context>
chip_gen: v7x
topology: tpu7x:2x2x1
jax: 0.10.0
libtpu: 0.0.40
codegen_flags: <defaults>
</compile_context>

<pallas_src>
import jax
import jax.numpy as jnp
from jax.experimental import pallas as pl
from jax.experimental.pallas import tpu as pltpu


# ------------------------------ helpers ----------------------------------- #

def _round_up(x, m):
    return ((x + m - 1) // m) * m


def _pick_tiles(n_dst, n_src):
    """dst-row tile (multiple of 8, <=256) and src/k tile (multiple of 128, <=512)."""
    tm = min(256, _round_up(n_dst, 8))
    tk = min(512, _round_up(n_src, 128))
    return tm, tk


# ----------------------------- Pallas kernels ------------------------------ #

def _feat_transform_kernel(h_ref, w_ref, o_ref):
    """HW[r, tile] = H[r, tile] @ W[r]   (bf16 in, f32 MXU accumulate, bf16 out)."""
    o_ref[0] = jnp.dot(
        h_ref[0], w_ref[0], preferred_element_type=jnp.float32
    ).astype(o_ref.dtype)


def feat_transform(h_stack, w_stack, *, ts):
    """h_stack: (R, n_src_pad, f_in) bf16, w_stack: (R, f_in, f_out) bf16
       -> (R, n_src_pad, f_out) bf16."""
    R, n_src, f_in = h_stack.shape
    f_out = w_stack.shape[-1]
    return pl.pallas_call(
        _feat_transform_kernel,
        out_shape=jax.ShapeDtypeStruct((R, n_src, f_out), jnp.bfloat16),
        grid_spec=pltpu.PrefetchScalarGridSpec(
            num_scalar_prefetch=0,
            grid=(R, n_src // ts),
            in_specs=[
                pl.BlockSpec((1, ts, f_in), lambda r, i: (r, i, 0)),
                pl.BlockSpec((1, f_in, f_out), lambda r, i: (r, 0, 0)),
            ],
            out_specs=pl.BlockSpec((1, ts, f_out), lambda r, i: (r, i, 0)),
        ),
        compiler_params=pltpu.CompilerParams(
            dimension_semantics=("parallel", "parallel")
        ),
    )(h_stack, w_stack)


def _agg_kernel(a_ref, hw_ref, b_ref, o_ref):
    """o[i] += A[r, i, k] @ HW[r, k]; add summed bias + ReLU on the last (r,k).

    a_ref:  (1, tm, tk)     bf16 normalized adjacency tile
    hw_ref: (1, tk, f_out)  bf16 pre-transformed features tile
    b_ref:  (1, f_out)      f32 sum of per-relation biases
    o_ref:  (tm, f_out)     f32 output tile (doubles as the accumulator)
    """
    r = pl.program_id(1)
    k = pl.program_id(2)

    @pl.when(jnp.logical_and(r == 0, k == 0))
    def _():
        o_ref[...] = jnp.zeros_like(o_ref)

    o_ref[...] += jnp.dot(a_ref[0], hw_ref[0], preferred_element_type=jnp.float32)

    @pl.when(jnp.logical_and(r == pl.num_programs(1) - 1,
                             k == pl.num_programs(2) - 1))
    def _():
        o_ref[...] = jnp.maximum(o_ref[...] + b_ref[...], 0.0)


def hetero_conv_dst(a_stack, hw_stack, b_total, *, tm, tk):
    """sum_r A_r @ HW_r + b_total, then ReLU, for one destination node type.

    a_stack:  (R, n_dst_pad, n_src_pad) bf16
    hw_stack: (R, n_src_pad, f_out)     bf16
    b_total:  (1, f_out)                f32
    returns:  (n_dst_pad, f_out)        f32
    """
    R, n_dst, n_src = a_stack.shape
    f_out = hw_stack.shape[-1]
    return pl.pallas_call(
        _agg_kernel,
        out_shape=jax.ShapeDtypeStruct((n_dst, f_out), jnp.float32),
        grid_spec=pltpu.PrefetchScalarGridSpec(
            num_scalar_prefetch=0,
            grid=(n_dst // tm, R, n_src // tk),
            in_specs=[
                pl.BlockSpec((1, tm, tk), lambda i, r, k: (r, i, k)),
                pl.BlockSpec((1, tk, f_out), lambda i, r, k: (r, k, 0)),
                pl.BlockSpec((1, f_out), lambda i, r, k: (0, 0)),
            ],
            out_specs=pl.BlockSpec((tm, f_out), lambda i, r, k: (i, 0)),
        ),
        compiler_params=pltpu.CompilerParams(
            dimension_semantics=("parallel", "arbitrary", "arbitrary")
        ),
    )(a_stack, hw_stack, b_total)


# ----------------------------- Graph / params ----------------------------- #

def normalize_adj(a):
    """DGL GraphConv norm='both': D_in^{-1/2} A D_out^{-1/2}, degrees clamp(min=1)."""
    in_deg = jnp.clip(a.sum(axis=1), 1.0, None)    # per dst node
    out_deg = jnp.clip(a.sum(axis=0), 1.0, None)   # per src node
    return a * (1.0 / jnp.sqrt(in_deg))[:, None] * (1.0 / jnp.sqrt(out_deg))[None, :]


def simulate(key, num_nodes):
    """Synthetic heterograph: (rel_name, src_type, dst_type) with dense adjacency."""
    rels = [
        ("follows", "user", "user"),
        ("rates", "user", "item"),
        ("rated-by", "item", "user"),
    ]
    keys = jax.random.split(key, len(rels))
    adj = {}
    for k, (name, src, dst) in zip(keys, rels):
        a = (jax.random.uniform(k, (num_nodes[dst], num_nodes[src])) < 0.3)
        adj[name] = normalize_adj(a.astype(jnp.float32))
    return rels, adj


def init_layer_params(key, rels, f_in, f_out):
    """Per-relation GraphConv weight (xavier-ish) and bias."""
    keys = jax.random.split(key, 2 * len(rels))
    params = {}
    for i, (name, _, _) in enumerate(rels):
        scale = jnp.sqrt(6.0 / (f_in + f_out))
        w = jax.random.uniform(keys[2 * i], (f_in, f_out), minval=-scale,
                               maxval=scale, dtype=jnp.float32)
        b = 0.1 * jax.random.normal(keys[2 * i + 1], (f_out,), jnp.float32)
        params[name] = (w, b)
    return params


def prepare_graph(rels, adj, num_nodes):
    """Build per-dst padded bf16 adjacency stacks ONCE (layer-invariant)."""
    graph = {}
    for dst in sorted({d for _, _, d in rels}):
        group = [(name, src) for (name, src, d) in rels if d == dst]
        n_dst = num_nodes[dst]
        n_src_max = max(num_nodes[src] for _, src in group)
        tm, tk = _pick_tiles(n_dst, n_src_max)
        n_dst_pad = _round_up(n_dst, tm)
        n_src_pad = _round_up(n_src_max, tk)
        a_list = []
        for name, src in group:
            a = jnp.zeros((n_dst_pad, n_src_pad), jnp.float32)
            a = a.at[:n_dst, :num_nodes[src]].set(adj[name])
            a_list.append(a)
        graph[dst] = dict(
            group=group, n_dst=n_dst, n_src_pad=n_src_pad, tm=tm, tk=tk,
            a_stack=jnp.stack(a_list).astype(jnp.bfloat16),
        )
    return graph


def hetero_layer(graph, num_nodes, feats, params):
    """One HeteroGraphConv + ReLU layer (one pallas_call pair per dst type)."""
    out = {}
    f_in = next(iter(feats.values())).shape[-1]
    for dst, g in graph.items():
        f_out = params[g["group"][0][0]][0].shape[-1]
        h_list, w_list = [], []
        b_total = jnp.zeros((1, f_out), jnp.float32)
        for name, src in g["group"]:
            n_src = num_nodes[src]
            h = jnp.zeros((g["n_src_pad"], f_in), jnp.float32)
            h = h.at[:n_src, :].set(feats[src])
            w, b = params[name]
            h_list.append(h)
            w_list.append(w)
            b_total = b_total + b.reshape(1, f_out)   # sum aggregation => exact
        h_stack = jnp.stack(h_list).astype(jnp.bfloat16)
        w_stack = jnp.stack(w_list).astype(jnp.bfloat16)
        hw_stack = feat_transform(h_stack, w_stack, ts=g["tk"])
        o = hetero_conv_dst(g["a_stack"], hw_stack, b_total,
                            tm=g["tm"], tk=g["tk"])
        out[dst] = o[: g["n_dst"]]
    return out


def rgcn_forward(graph, num_nodes, inputs, layer_params):
    h = inputs
    for params in layer_params:
        h = hetero_layer(graph, num_nodes, h, params)
    return h


# Pure-JAX f32 reference for correctness checking.
def rgcn_reference(rels, adj, inputs, layer_params):
    h = inputs
    for params in layer_params:
        new_h = {}
        for dst in sorted({d for _, _, d in rels}):
            acc = None
            for name, src, d in rels:
                if d != dst:
                    continue
                w, b = params[name]
                contrib = adj[name] @ h[src] @ w + b[None, :]
                acc = contrib if acc is None else acc + contrib
            new_h[dst] = jnp.maximum(acc, 0.0)
        h = new_h
    return h


# --------------------------------- main ----------------------------------- #

if __name__ == "__main__":
    # Lane-dense feature widths (multiples of 128 for the stored dimension).
    in_feats, hidden_feats, out_feats = 32, 128, 128
    num_nodes = {"user": 128, "item": 256}

    key = jax.random.PRNGKey(0)
    k_graph, k_feat_u, k_feat_i, k_l1, k_l2 = jax.random.split(key, 5)

    rels, adj = simulate(k_graph, num_nodes)
    graph = prepare_graph(rels, adj, num_nodes)   # padded bf16 A, built once

    inputs = {
        "user": jax.random.normal(k_feat_u, (num_nodes["user"], in_feats), jnp.float32),
        "item": jax.random.normal(k_feat_i, (num_nodes["item"], in_feats), jnp.float32),
    }

    layer_params = [
        init_layer_params(k_l1, rels, in_feats, hidden_feats),
        init_layer_params(k_l2, rels, hidden_feats, out_feats),
    ]

    out = rgcn_forward(graph, num_nodes, inputs, layer_params)
    out = {k: jax.block_until_ready(v) for k, v in out.items()}

    ref = rgcn_reference(rels, adj, inputs, layer_params)
    for k in out:
        assert out[k].shape == (num_nodes[k], out_feats)
        # bf16 operands (f32 accumulation) -> loosened tolerance vs f32 reference.
        assert jnp.allclose(out[k], ref[k], atol=5e-2, rtol=5e-2), f"mismatch for {k}"

    print("KERNEL_OK")
</pallas_src>

<mosaic_0001>
module attributes {stable_mosaic.version = 11 : i64} {
  func.func @_feat_transform_kernel(%arg0: i32, %arg1: i32, %arg2: memref<1x128x32xbf16, #tpu.memory_space<vmem>>, %arg3: memref<1x32x128xbf16, #tpu.memory_space<vmem>>, %arg4: memref<1x128x128xbf16, #tpu.memory_space<vmem>>) attributes {dimension_semantics = [#tpu.dimension_semantics<parallel>, #tpu.dimension_semantics<parallel>], iteration_bounds = array<i64: 1, 1>, scalar_prefetch = 0 : i64, scratch_operands = 0 : i64, tpu.core_type = #tpu.core_type<tc>, window_params = [{transform_indices = @transform_0, window_bounds = array<i64: 1, 128, 32>}, {transform_indices = @transform_1, window_bounds = array<i64: 1, 32, 128>}, {transform_indices = @transform_2, window_bounds = array<i64: 1, 128, 128>}]} {
    %c0 = arith.constant 0 : index
    %c0_0 = arith.constant 0 : index
    %c0_1 = arith.constant 0 : index
    %0 = vector.load %arg2[%c0, %c0_0, %c0_1] : memref<1x128x32xbf16, #tpu.memory_space<vmem>>, vector<1x128x32xbf16>
    %1 = vector.shape_cast %0 : vector<1x128x32xbf16> to vector<128x32xbf16>
    %c0_2 = arith.constant 0 : index
    %c0_3 = arith.constant 0 : index
    %c0_4 = arith.constant 0 : index
    %2 = vector.load %arg3[%c0_2, %c0_3, %c0_4] : memref<1x32x128xbf16, #tpu.memory_space<vmem>>, vector<1x32x128xbf16>
    %3 = vector.shape_cast %2 : vector<1x32x128xbf16> to vector<32x128xbf16>
    %cst = arith.constant dense<0.000000e+00> : vector<128x128xf32>
    %4 = tpu.matmul %1, %3, %cst {dimension_numbers = #tpu.dot_dimension_numbers<[1], [0], [0], [1], [0, 0, 1, 1], [], []>} : vector<128x32xbf16>, vector<32x128xbf16>, vector<128x128xf32> -> vector<128x128xf32>
    %5 = arith.truncf %4 : vector<128x128xf32> to vector<128x128xbf16>
    %c0_5 = arith.constant 0 : index
    %c0_6 = arith.constant 0 : index
    %c0_7 = arith.constant 0 : index
    %6 = vector.load %arg4[%c0_5, %c0_6, %c0_7] : memref<1x128x128xbf16, #tpu.memory_space<vmem>>, vector<1x128x128xbf16>
    %7 = vector.shape_cast %6 : vector<1x128x128xbf16> to vector<128x128xbf16>
    %8 = vector.shape_cast %5 : vector<128x128xbf16> to vector<1x128x128xbf16>
    tpu.vector_store %arg4[%c0_5, %c0_6, %c0_7], %8 {strides = array<i32>} : memref<1x128x128xbf16, #tpu.memory_space<vmem>>, vector<1x128x128xbf16>,
    return
  }
  func.func @transform_0(%arg0: i32, %arg1: i32) -> (i32, i32, i32) {
    %c0_i32 = arith.constant 0 : i32
    %c0_i32_0 = arith.constant 0 : i32
    return %arg0, %arg1, %c0_i32 : i32, i32, i32
  }
  func.func @transform_1(%arg0: i32, %arg1: i32) -> (i32, i32, i32) {
    %c0_i32 = arith.constant 0 : i32
    %c0_i32_0 = arith.constant 0 : i32
    %c0_i32_1 = arith.constant 0 : i32
    return %arg0, %c0_i32, %c0_i32_0 : i32, i32, i32
  }
  func.func @transform_2(%arg0: i32, %arg1: i32) -> (i32, i32, i32) {
    %c0_i32 = arith.constant 0 : i32
    %c0_i32_0 = arith.constant 0 : i32
    return %arg0, %arg1, %c0_i32 : i32, i32, i32
  }
}

</mosaic_0001>

<bundles_post_ra>
// kernel: tpu_custom_call.1
= control target key start
LH: loop header
LB: loop body
LE: loop exit
PB: predicated region body
PF: predicated region fallthrough
CT: control target
= control target key end

     0   :  { %vm85_vm0 = vcmask 261120   ;;  %s539_s0 = inlined_call_operand.vmem [shape: bf16[1,128,32], index: 0, kind: input, shape index: {}]   ;;  %s540_s1 = inlined_call_operand.vmem [shape: bf16[1,32,128], index: 1, kind: input, shape index: {}]   ;;  %s541_s2 = inlined_call_operand.hbm [shape: bf16[1,128,128], index: 2, kind: output, shape index: {}]  }
   0x1   :  { %v437_v0 = vld [vmem:[%s540_s1] sm:$0xff]   ;;  %v438_v1 = vld [vmem:[%s540_s1 + $0x8] sm:$0xff]   ;;  %v443_v6 = vld [vmem:[%s539_s0 + $0x10] sm:$0xff]  }
   0x2   :  { %410 = vmatprep.subr.bf16.mxu0 %v437_v0  ;;  %430 = vmatprep.subr.bf16.mxu1 %v437_v0  ;;  %v439_v2 = vld [vmem:[%s539_s0] sm:$0xff]   ;;  %v441_v4 = vld [vmem:[%s539_s0 + $0x8] sm:$0xff]   ;;  %v444_v7 = vld [vmem:[%s539_s0 + $0x30] sm:$0xff]  }
   0x3   :  { %411 = vmatpush3.bf16.msra.mxu0 %v437_v0  ;;  %432 = vmatpush3.bf16.msra.mxu1 %v437_v0  ;;  %v440_v3 = vld [vmem:[%s539_s0 + $0x20] sm:$0xff]   ;;  %v442_v5 = vld [vmem:[%s539_s0 + $0x28] sm:$0xff]  }
   0x4   :  { %412 = vmatprep.subr.bf16.mxu0 %v438_v1  ;;  %431 = vmatprep.subr.bf16.mxu1 %v438_v1 }
   0x5   :  { %414 = vmatprep.mubr.msk.bf16.mxu0 %vm85_vm0, %v439_v2  ;;  %422 = vmatprep.mubr.msk.bf16.mxu1 %vm85_vm0, %v440_v3 }
   0x7   :  { %413 = vmatpush3.bf16.msra.mxu0 %v438_v1  ;;  %433 = vmatpush3.bf16.msra.mxu1 %v438_v1 }
   0xa   :  { %415 = vmatmul.mubr.msk.bf16.vlgmr.msra.gmra.mrb[0].mxu0 %vm85_vm0, %v441_v4  ;;  %423 = vmatmul.mubr.msk.bf16.vlgmr.msra.gmra.mrb[0].mxu1 %vm85_vm0, %v442_v5 }
   0xb   :  { %7 = vsyncpa [#allocation3], 0  ;;  %418 = vmatprep.mubr.msk.bf16.mxu0 %vm85_vm0, %v443_v6  ;;  %426 = vmatprep.mubr.msk.bf16.mxu1 %vm85_vm0, %v444_v7  ;;  %v445_v8 = vld [vmem:[%s539_s0 + $0x18] sm:$0xff]  }
   0xc   :  { %v446_v9 = vld [vmem:[%s539_s0 + $0x38] sm:$0xff]   ;;  %s471_s0 = smov [#allocation2]  }
   0xd   :  { %s292_s28 = sshll.u32 %s471_s0, 4  ;;  %s293_s28 = int_to_ptr.vmem [resolvable:$true] %s292_s28 }
   0xe   :  { %s447_s29 = scalar_lea.vmem %s293_s28, 1024  ;;  %p452_p1 = scmp.lt.s32.totalorder %s293_s28, %s293_s28 }
   0xf   :  { %p448_p0 = scmp.ne.s32.totalorder %s293_s28, %s447_s29  ;;  %p453_p2 = scmp.lt.s32.totalorder %s447_s29, %s447_s29 }
  0x11   :  { %p454_p3 = por %p453_p2, %p452_p1 }
  0x12   :  { %419 = vmatmul.mubr.msk.bf16.gmra.mrb[4].mxu0 %vm85_vm0, %v445_v8  ;;  %427 = vmatmul.mubr.msk.bf16.gmra.mrb[4].mxu1 %vm85_vm0, %v446_v9 }
  0x13   :  { %p455_p4 = pnand %p454_p3, %p448_p0 }
  0xdd   :  { %v416_v10 = vpop.f32.mrb[0].mxu0  ;;  %v424_v11 = vpop.f32.mrb[0].mxu1 }
  0xde   :  { %v144_v12 = vpop.f32.mrb[1].mxu0  ;;  %v176_v13 = vpop.f32.mrb[1].mxu1 }
  0xdf   :  { %v417_v14 = vpop.f32.mrb[2].mxu0  ;;  %v425_v15 = vpop.f32.mrb[2].mxu1 }
  0xe0   :  { %v361_v16 = vpack.c.bf16 %v417_v14, %v416_v10  ;;  %v381_v17 = vpack.c.bf16 %v425_v15, %v424_v11  ;;  %v147_v18 = vpop.f32.mrb[3].mxu0  ;;  %v179_v19 = vpop.f32.mrb[3].mxu1 }
  0xe1   :  { %v356_v20 = vpack.c.bf16 %v147_v18, %v144_v12  ;;  %v376_v21 = vpack.c.bf16 %v179_v19, %v176_v13 }
  0xe2   :  { %393 = vst [vmem:[#allocation2 + $0x8] sm:$0xff] %v361_v16   ;;  %397 = vst [vmem:[#allocation2 + $0x28] sm:$0xff] %v381_v17  }
  0xe3   :  { %357 = vst [vmem:[#allocation2] sm:$0xff] %v356_v20   ;;  %396 = vst [vmem:[#allocation2 + $0x20] sm:$0xff] %v376_v21  }
  0xe5   :  { %v420_v22 = vpop.f32.mrb[4].mxu0  ;;  %v428_v23 = vpop.f32.mrb[4].mxu1 }
  0xe6   :  { %v160_v24 = vpop.f32.mrb[5].mxu0  ;;  %v192_v25 = vpop.f32.mrb[5].mxu1 }
  0xe7   :  { %v421_v26 = vpop.f32.mrb[6].mxu0  ;;  %v429_v27 = vpop.f32.mrb[6].mxu1 }
  0xe8   :  { %v371_v28 = vpack.c.bf16 %v421_v26, %v420_v22  ;;  %v391_v29 = vpack.c.bf16 %v429_v27, %v428_v23  ;;  %v163_v30 = vpop.f32.mrb[7].mxu0  ;;  %v195_v31 = vpop.f32.mrb[7].mxu1 }
  0xe9   :  { %v366_v32 = vpack.c.bf16 %v163_v30, %v160_v24  ;;  %v386_v33 = vpack.c.bf16 %v195_v31, %v192_v25 }
  0xea   :  { %395 = vst [vmem:[#allocation2 + $0x18] sm:$0xff] %v371_v28   ;;  %399 = vst [vmem:[#allocation2 + $0x38] sm:$0xff] %v391_v29  }
  0xeb   :  { %394 = vst [vmem:[#allocation2 + $0x10] sm:$0xff] %v366_v32   ;;  %398 = vst [vmem:[#allocation2 + $0x30] sm:$0xff] %v386_v33  }
  0xec   :  { %458 = shalt.err (!%p455_p4)
}
  0xed   :  { %s459_s4 = scalar_lea.hbm %s541_s2, 1024 }
  0xee   :  { %p460_p5 = scmp.ne.s32.totalorder %s541_s2, %s459_s4  ;;  %p463_p6 = scmp.lt.u32.totalorder %s459_s4, %s541_s2 }
  0xf0   :  { %p465_p7 = pnand %p463_p6, %p460_p5 }
  0xf2   :  { %468 = shalt.err (!%p465_p7)
}
  0xf3   :  { %s472_s9 = smov 64   ;;  %s473_s10 = smov 4  }
  0xf4   :  { %298 = dma.vmem_to_hbm [thread:$0]  %s293_s28, 1024, %s541_s2, [#allocation3], %s472_s9, %s472_s9, %s473_s10  }
  0xf5   :  { %469 = dma.done.wait [#allocation3], 1024  }
  0xf6   :  { %470 = vsyncadd [#allocation3], 4294966272 }
  0xf7   :  { %302 = vsyncpa [#allocation3], 1 }

</bundles_post_ra>
